<compile_context>
chip_gen: v5e
topology: v5e:2x2
jax: 0.10.0
libtpu: 0.0.40
codegen_flags: <defaults>
</compile_context>

<pallas_src>
import functools

import jax
import jax.numpy as jnp
from jax import lax
from jax.experimental import pallas as pl
from jax.experimental.pallas import tpu as pltpu


# --------------------------------------------------------------- TPU helpers --
@functools.lru_cache(maxsize=1)
def _phys_vmem_bytes():
    try:
        return int(pltpu.get_tpu_info().vmem_capacity_bytes)
    except Exception:
        return 64 * 1024 * 1024            # conservative fallback: v7x physical


def _vmem_limit(nbytes):
    # 4x headroom over the raw per-step estimate (double buffering + f32
    # temps), floored at 16 MiB, capped 12 MiB below physical VMEM so Mosaic
    # keeps room for internal scratch / semaphores (~52 MiB on v7x, ~116 MiB
    # on v5e/v6e) instead of a fixed, generation-blind 60 MiB cap.
    cap = _phys_vmem_bytes() - 12 * 1024 * 1024
    return int(min(max(4 * nbytes, 16 * 1024 * 1024), cap))


def _row_tile(m, tm, dtype):
    # Round row tiles to full sublane packs: 8 rows for 32-bit, 16 for bf16,
    # 32 for 8-bit dtypes (sub-32-bit dtypes pack along sublanes).
    tm = min(tm, m)
    if tm != m:
        grain = max(8, 32 // jnp.dtype(dtype).itemsize)
        tm = max(grain, (tm // grain) * grain)
    return tm


def _single_buffered(block_shape, index_map):
    # Constant-index operands (weights / biases) gain nothing from double
    # buffering; single-buffer them to reclaim VMEM for larger row tiles.
    if hasattr(pl, "Buffered"):
        try:
            return pl.BlockSpec(block_shape, index_map,
                                pipeline_mode=pl.Buffered(1))
        except TypeError:
            pass
    return pl.BlockSpec(block_shape, index_map)


def _heads_per_group(num_heads, head_dim):
    # Smallest divisor of num_heads whose lane width (hpg * head_dim) is a
    # multiple of 128: per-group k/v blocks stay small and every store is an
    # unmasked full-lane store.  Fallback: all heads (lane width == embed_dim,
    # which always satisfies the layout rule because it equals the full dim).
    for hpg in range(1, num_heads + 1):
        if num_heads % hpg:
            continue
        lanes = hpg * head_dim
        if lanes > 256:
            break
        if lanes % 128 == 0:
            return hpg
    return num_heads


# ---------------------------------------------------------- fused QKV matmul --
def _qkv_proj_kernel(x_ref, w_ref, b_ref, o_ref):
    # x:(TM,E) w:(E,E) b:(1,E) o:(TM,E); which projection (q/k/v) is a grid axis.
    y = jnp.dot(x_ref[...], w_ref[...], preferred_element_type=jnp.float32)
    o_ref[...] = (y + b_ref[...]).astype(o_ref.dtype)


def qkv_proj(x2d, w_qkv, b_qkv, *, tm=512):
    """x2d:(M,E), w_qkv:(3,E,E), b_qkv:(3,1,E) -> stacked (3,M,E) q/k/v."""
    m, e = x2d.shape
    tm = _row_tile(m, tm, x2d.dtype)
    itemsize = x2d.dtype.itemsize
    nbytes = (2 * tm * e) * itemsize \
        + (e * e + e) * w_qkv.dtype.itemsize + tm * e * 4
    return pl.pallas_call(
        _qkv_proj_kernel,
        # Projection index is the OUTER grid axis so each (E,E) weight stays
        # resident across the whole inner row loop (each weight read once).
        grid=(3, pl.cdiv(m, tm)),
        out_shape=jax.ShapeDtypeStruct((3, m, e), x2d.dtype),
        in_specs=[
            pl.BlockSpec((tm, e), lambda j, i: (i, 0)),
            _single_buffered((None, e, e), lambda j, i: (j, 0, 0)),
            _single_buffered((None, 1, e), lambda j, i: (j, 0, 0)),
        ],
        out_specs=pl.BlockSpec((None, tm, e), lambda j, i: (j, i, 0)),
        compiler_params=pltpu.CompilerParams(
            dimension_semantics=("parallel", "parallel"),
            vmem_limit_bytes=_vmem_limit(nbytes),
        ),
    )(x2d, w_qkv, b_qkv)


# ------------------------------------------------------------- output linear --
def _linear_kernel(x_ref, w_ref, b_ref, o_ref):
    y = jnp.dot(x_ref[...], w_ref[...], preferred_element_type=jnp.float32)
    o_ref[...] = (y + b_ref[...]).astype(o_ref.dtype)


def linear(x2d, w, b, *, tm=512):
    m, e_in = x2d.shape
    e_out = w.shape[1]
    tm = _row_tile(m, tm, x2d.dtype)
    itemsize = x2d.dtype.itemsize
    nbytes = (tm * e_in + tm * e_out) * itemsize \
        + (e_in * e_out + e_out) * w.dtype.itemsize + tm * e_out * 4
    return pl.pallas_call(
        _linear_kernel,
        grid=(pl.cdiv(m, tm),),
        out_shape=jax.ShapeDtypeStruct((m, e_out), x2d.dtype),
        in_specs=[
            pl.BlockSpec((tm, e_in), lambda i: (i, 0)),
            _single_buffered((e_in, e_out), lambda i: (0, 0)),
            _single_buffered((1, e_out), lambda i: (0, 0)),
        ],
        out_specs=pl.BlockSpec((tm, e_out), lambda i: (i, 0)),
        compiler_params=pltpu.CompilerParams(
            dimension_semantics=("parallel",),
            vmem_limit_bytes=_vmem_limit(nbytes),
        ),
    )(x2d, w, b)


# ----------------------------------------------------------------- attention --
def _mha_body(q_ref, k_ref, v_ref, o_ref, w_ref, heads_per_group, head_dim):
    # Blocks: q:(TQ,GL) k/v:(T,GL) o:(TQ,GL) w:(HPG,TQ,T) or None, GL=HPG*Dh.
    # Scale is already folded into the q projection weights.
    outs = []
    for h in range(heads_per_group):
        lo = h * head_dim
        hi = lo + head_dim
        q_h = q_ref[:, lo:hi]                           # (TQ, Dh)
        k_h = k_ref[:, lo:hi]                           # (T,  Dh)
        v_h = v_ref[:, lo:hi]                           # (T,  Dh)
        # scores (TQ, T): contract Dh directly — no explicit k.T materialized.
        s = lax.dot_general(q_h, k_h, (((1,), (1,)), ((), ())),
                            preferred_element_type=jnp.float32)
        s = s - jnp.max(s, axis=-1, keepdims=True)
        p = jnp.exp(s)
        l = jnp.sum(p, axis=-1, keepdims=True)
        if w_ref is not None:
            w = p / l                                   # exact softmax for output
            w_ref[h] = w.astype(w_ref.dtype)
            o_h = jnp.dot(w.astype(v_h.dtype), v_h,
                          preferred_element_type=jnp.float32)
        else:
            # Normalize after PV: (TQ, Dh) multiply instead of (TQ, T) divide.
            o_h = jnp.dot(p.astype(v_h.dtype), v_h,
                          preferred_element_type=jnp.float32)
            o_h = o_h * pl.reciprocal(l, approx=True)
        outs.append(o_h)
    o = outs[0] if len(outs) == 1 else jnp.concatenate(outs, axis=-1)
    o_ref[...] = o.astype(o_ref.dtype)                  # one lane-dense store


def _mha_kernel(q_ref, k_ref, v_ref, o_ref, *, heads_per_group, head_dim):
    _mha_body(q_ref, k_ref, v_ref, o_ref, None, heads_per_group, head_dim)


def _mha_kernel_with_weights(q_ref, k_ref, v_ref, o_ref, w_ref, *,
                             heads_per_group, head_dim):
    _mha_body(q_ref, k_ref, v_ref, o_ref, w_ref, heads_per_group, head_dim)


def attention(qkv, num_heads, *, output_attentions=False, tq=256):
    """qkv: stacked (3, B, T, E) q/k/v (q already pre-scaled by 1/sqrt(Dh))."""
    _, b, t, e = qkv.shape
    head_dim = e // num_heads
    hpg = _heads_per_group(num_heads, head_dim)
    gl = hpg * head_dim                       # lanes per head group
    n_groups = num_heads // hpg
    tq = _row_tile(t, tq, qkv.dtype)
    nq = pl.cdiv(t, tq)
    itemsize = qkv.dtype.itemsize

    nbytes = (2 * tq * gl + 2 * t * gl) * itemsize + 2 * tq * t * 4
    if output_attentions:
        nbytes += hpg * tq * t * itemsize + tq * t * 4

    q_spec = pl.BlockSpec((None, None, tq, gl), lambda bi, hg, qi: (0, bi, qi, hg))
    k_spec = pl.BlockSpec((None, None, t, gl), lambda bi, hg, qi: (1, bi, 0, hg))
    v_spec = pl.BlockSpec((None, None, t, gl), lambda bi, hg, qi: (2, bi, 0, hg))
    o_spec = pl.BlockSpec((None, tq, gl), lambda bi, hg, qi: (bi, qi, hg))
    cp = pltpu.CompilerParams(
        dimension_semantics=("parallel", "parallel", "parallel"),
        vmem_limit_bytes=_vmem_limit(nbytes),
    )

    if output_attentions:
        kern = functools.partial(_mha_kernel_with_weights,
                                 heads_per_group=hpg, head_dim=head_dim)
        out, weights = pl.pallas_call(
            kern,
            grid=(b, n_groups, nq),
            out_shape=(
                jax.ShapeDtypeStruct((b, t, e), qkv.dtype),
                jax.ShapeDtypeStruct((b, num_heads, t, t), qkv.dtype),
            ),
            in_specs=[q_spec, k_spec, v_spec],
            out_specs=(
                o_spec,
                pl.BlockSpec((None, hpg, tq, t),
                             lambda bi, hg, qi: (bi, hg, qi, 0)),
            ),
            compiler_params=cp,
        )(qkv, qkv, qkv)
        return out, weights

    kern = functools.partial(_mha_kernel,
                             heads_per_group=hpg, head_dim=head_dim)
    out = pl.pallas_call(
        kern,
        grid=(b, n_groups, nq),
        out_shape=jax.ShapeDtypeStruct((b, t, e), qkv.dtype),
        in_specs=[q_spec, k_spec, v_spec],
        out_specs=o_spec,
        compiler_params=cp,
    )(qkv, qkv, qkv)
    return out, None


# ----------------------------------------------------- parameter prep (once) --
def prepare_whisper_attention_params(params, num_heads, dtype=None):
    """ONE-TIME parameter prep: call at load time, NOT per forward call.

    Stacks q/k/v weights into (3,E,E) and biases into (3,1,E) with the
    1/sqrt(head_dim) scale folded into the q slice (k_proj has bias=False ->
    zero bias slice, no extra DMA).  `dtype` (e.g. jnp.bfloat16) optionally
    casts the stored weights to halve HBM weight traffic."""
    e = params["q_w"].shape[0]
    head_dim = e // num_heads
    scale = head_dim ** -0.5
    dtype = dtype if dtype is not None else params["q_w"].dtype
    k_b = params.get("k_b")
    if k_b is None:
        k_b = jnp.zeros_like(params["q_b"])
    w_qkv = jnp.stack([params["q_w"] * scale, params["k_w"], params["v_w"]])
    b_qkv = jnp.stack([params["q_b"] * scale, k_b, params["v_b"]])
    return {
        "w_qkv": w_qkv.astype(dtype),
        "b_qkv": b_qkv.astype(dtype),
        "o_w": params["o_w"].astype(dtype),
        "o_b": params["o_b"].astype(dtype),
    }


# ------------------------------------------------------------------- wrapper --
def whisper_attention(hidden_states, prepared, num_heads, *,
                      output_attentions=False):
    """Self-attention path of WhisperAttention.forward (eval mode).

    `prepared` comes from prepare_whisper_attention_params (the weight
    fusion is hoisted out of the per-call path)."""
    B, T, E = hidden_states.shape
    x2d = hidden_states.reshape(B * T, E)

    # Fused q/k/v projection -> stacked (3, B, T, E).  Heads stay packed in
    # the lane (E) dimension; the attention kernel slices its 128-lane head
    # group straight out of this array, so there are no XLA head transposes
    # and no q/k/v slice copies anywhere.
    qkv = qkv_proj(x2d, prepared["w_qkv"], prepared["b_qkv"]).reshape(3, B, T, E)

    attn_out, attn_weights = attention(
        qkv, num_heads, output_attentions=output_attentions)

    out2d = linear(attn_out.reshape(B * T, E), prepared["o_w"], prepared["o_b"])
    return out2d.reshape(B, T, E), attn_weights
    # TODO(synk): cross-attention (key_value_states), past_key_value cache,
    # attention_mask, layer_head_mask and dropout branches of
    # WhisperAttention.forward are not implemented (eval-mode self-attention).


# ----------------------------------------------------------------- reference --
def whisper_attention_ref(x, params, num_heads):
    B, T, E = x.shape
    Dh = E // num_heads
    scale = Dh ** -0.5
    q = (x @ params["q_w"] + params["q_b"]) * scale
    k = x @ params["k_w"]
    v = x @ params["v_w"] + params["v_b"]

    def to_heads(t):
        return t.reshape(B, T, num_heads, Dh).transpose(0, 2, 1, 3)

    q, k, v = to_heads(q), to_heads(k), to_heads(v)
    s = jnp.einsum("bhqd,bhkd->bhqk", q, k)
    w = jax.nn.softmax(s, axis=-1)
    o = jnp.einsum("bhqk,bhkd->bhqd", w, v)
    o = o.transpose(0, 2, 1, 3).reshape(B, T, E)
    return o @ params["o_w"] + params["o_b"], w


# ---------------------------------------------------------------------- main --
if __name__ == "__main__":
    B, T, E, H = 2, 8, 32, 4  # batch, seq, embed_dim, num_heads (head_dim = 8)

    key = jax.random.PRNGKey(0)
    keys = jax.random.split(key, 8)
    init = lambda k, shape: (0.02 * jax.random.normal(k, shape)).astype(jnp.float32)

    # Weights stored as (in, out); equivalent to PyTorch nn.Linear's W.T.
    params = {
        "q_w": init(keys[0], (E, E)), "q_b": init(keys[1], (1, E)),
        "k_w": init(keys[2], (E, E)),                                # bias=False
        "v_w": init(keys[3], (E, E)), "v_b": init(keys[4], (1, E)),
        "o_w": init(keys[5], (E, E)), "o_b": init(keys[6], (1, E)),
    }
    x = jax.random.normal(keys[7], (B, T, E), dtype=jnp.float32)

    # One-time parameter fusion (hoisted out of the forward path).
    prepared = prepare_whisper_attention_params(params, H)

    # With attention weights (matches the module's return signature).
    out, attn_weights = whisper_attention(x, prepared, H, output_attentions=True)
    out = jax.block_until_ready(out)
    attn_weights = jax.block_until_ready(attn_weights)

    # Default fast path: no (B,H,T,T) HBM writeback.
    out_nw, no_w = whisper_attention(x, prepared, H)
    out_nw = jax.block_until_ready(out_nw)

    ref_out, ref_w = whisper_attention_ref(x, params, H)
    assert out.shape == (B, T, E)
    assert attn_weights.shape == (B, H, T, T)
    assert no_w is None
    # Fast path uses the EUP approximate reciprocal; weights path is exact.
    assert jnp.allclose(out, ref_out, rtol=5e-3, atol=5e-4)
    assert jnp.allclose(out_nw, ref_out, rtol=5e-3, atol=5e-4)
    assert jnp.allclose(attn_weights, ref_w, rtol=5e-3, atol=5e-4)

    print("KERNEL_OK")
</pallas_src>

<mosaic_0001>
module attributes {stable_mosaic.version = 11 : i64} {
  func.func @_qkv_proj_kernel(%arg0: i32, %arg1: i32, %arg2: memref<16x32xf32, #tpu.memory_space<vmem>>, %arg3: memref<1x32x32xf32, #tpu.memory_space<vmem>>, %arg4: memref<1x1x32xf32, #tpu.memory_space<vmem>>, %arg5: memref<1x16x32xf32, #tpu.memory_space<vmem>>) attributes {dimension_semantics = [#tpu.dimension_semantics<parallel>, #tpu.dimension_semantics<parallel>], iteration_bounds = array<i64: 3, 1>, scalar_prefetch = 0 : i64, scratch_operands = 0 : i64, tpu.core_type = #tpu.core_type<tc>, window_params = [{transform_indices = @transform_0, window_bounds = array<i64: 16, 32>}, {pipeline_mode = #tpu.pipeline_mode<synchronous>, transform_indices = @transform_1, window_bounds = array<i64: 1, 32, 32>}, {pipeline_mode = #tpu.pipeline_mode<synchronous>, transform_indices = @transform_2, window_bounds = array<i64: 1, 1, 32>}, {transform_indices = @transform_3, window_bounds = array<i64: 1, 16, 32>}]} {
    %c0 = arith.constant 0 : index
    %c0_0 = arith.constant 0 : index
    %0 = vector.load %arg2[%c0, %c0_0] : memref<16x32xf32, #tpu.memory_space<vmem>>, vector<16x32xf32>
    %c0_1 = arith.constant 0 : index
    %c0_2 = arith.constant 0 : index
    %c0_3 = arith.constant 0 : index
    %1 = vector.load %arg3[%c0_1, %c0_2, %c0_3] : memref<1x32x32xf32, #tpu.memory_space<vmem>>, vector<1x32x32xf32>
    %2 = vector.shape_cast %1 : vector<1x32x32xf32> to vector<32x32xf32>
    %cst = arith.constant dense<0.000000e+00> : vector<16x32xf32>
    %3 = tpu.matmul %0, %2, %cst {dimension_numbers = #tpu.dot_dimension_numbers<[1], [0], [0], [1], [0, 0, 1, 1], [], []>} : vector<16x32xf32>, vector<32x32xf32>, vector<16x32xf32> -> vector<16x32xf32>
    %c0_4 = arith.constant 0 : index
    %c0_5 = arith.constant 0 : index
    %c0_6 = arith.constant 0 : index
    %4 = vector.load %arg4[%c0_4, %c0_5, %c0_6] : memref<1x1x32xf32, #tpu.memory_space<vmem>>, vector<1x1x32xf32>
    %5 = vector.shape_cast %4 : vector<1x1x32xf32> to vector<1x32xf32>
    %6 = vector.broadcast %5 : vector<1x32xf32> to vector<16x32xf32>
    %7 = arith.addf %3, %6 : vector<16x32xf32>
    %c0_7 = arith.constant 0 : index
    %c0_8 = arith.constant 0 : index
    %c0_9 = arith.constant 0 : index
    %8 = vector.load %arg5[%c0_7, %c0_8, %c0_9] : memref<1x16x32xf32, #tpu.memory_space<vmem>>, vector<1x16x32xf32>
    %9 = vector.shape_cast %8 : vector<1x16x32xf32> to vector<16x32xf32>
    %10 = vector.shape_cast %7 : vector<16x32xf32> to vector<1x16x32xf32>
    tpu.vector_store %arg5[%c0_7, %c0_8, %c0_9], %10 {strides = array<i32>} : memref<1x16x32xf32, #tpu.memory_space<vmem>>, vector<1x16x32xf32>,
    return
  }
  func.func @transform_0(%arg0: i32, %arg1: i32) -> (i32, i32) {
    %c0_i32 = arith.constant 0 : i32
    %c0_i32_0 = arith.constant 0 : i32
    return %arg1, %c0_i32 : i32, i32
  }
  func.func @transform_1(%arg0: i32, %arg1: i32) -> (i32, i32, i32) {
    %c0_i32 = arith.constant 0 : i32
    %c0_i32_0 = arith.constant 0 : i32
    %c0_i32_1 = arith.constant 0 : i32
    return %arg0, %c0_i32, %c0_i32_0 : i32, i32, i32
  }
  func.func @transform_2(%arg0: i32, %arg1: i32) -> (i32, i32, i32) {
    %c0_i32 = arith.constant 0 : i32
    %c0_i32_0 = arith.constant 0 : i32
    %c0_i32_1 = arith.constant 0 : i32
    return %arg0, %c0_i32, %c0_i32_0 : i32, i32, i32
  }
  func.func @transform_3(%arg0: i32, %arg1: i32) -> (i32, i32, i32) {
    %c0_i32 = arith.constant 0 : i32
    %c0_i32_0 = arith.constant 0 : i32
    return %arg0, %arg1, %c0_i32 : i32, i32, i32
  }
}

</mosaic_0001>

<bundles_post_ra>
// kernel: tpu_custom_call.1
= control target key start
LH: loop header
LB: loop body
LE: loop exit
PB: predicated region body
PF: predicated region fallthrough
CT: control target
= control target key end

     0   :  { %s873_s0 = inlined_call_operand.hbm [shape: f32[16,32], index: 0, kind: input, shape index: {}]   ;;  %s874_s1 = inlined_call_operand.hbm [shape: f32[3,32,32], index: 1, kind: input, shape index: {}]   ;;  %s875_s2 = inlined_call_operand.hbm [shape: f32[3,1,32], index: 2, kind: input, shape index: {}]   ;;  %s876_s3 = inlined_call_operand.hbm [shape: f32[3,16,32], index: 3, kind: output, shape index: {}]  }
   0x1   :  { %878 = sst [smem:[#allocation12_spill]] %s873_s0 }
   0x2   :  { %879 = sst [smem:[#allocation13_spill]] %s874_s1 }
   0x3   :  { %8 = vsyncpa [#allocation3], 0 }
   0x4   :  { %9 = vsyncpa [#allocation6], 0 }
   0x5   :  { %10 = vsyncpa [#allocation4], 0 }
   0x6   :  { %12 = vsyncpa [#allocation4 + $0x1], 0  ;;  %s702_s12 = smov 0   ;;  %s704_s13 = smov 0  }
   0x7   :  { %s706_s14 = smov 0   ;;  %s708_s15 = smov 0  }
   0x8   :  { %s710_s16 = smov 0   ;;  %s712_s17 = smov 0  }
   0x9 LB: > { %s392_s18 = sadd.s32 4294967295, %s673_s17   ;;  %s393_s19 = sadd.s32 4294967294, %s673_s17   ;;  %s673_s17 = sphi %s712_s17, %s18_s17   ;;  %s669_s16 = sphi %s710_s16, %s893_s16   ;;  %s665_s15 = sphi %s708_s15, %s892_s15   ;;  %s661_s14 = sphi %s706_s14, %s891_s14   ;;  %s657_s13 = sphi %s704_s13, %s890_s13   ;;  %s653_s12 = sphi %s702_s12, %s889_s12  }
   0xa   : > { %s30_s20 = sadd.s32 1, %s669_s16  ;;  %s63_s21 = sadd.s32 1, %s661_s14 }
   0xb   : > { %p32_p0 = scmp.ge.s32.totalorder %s30_s20, 3  ;;  %p76_p1 = scmp.ne.s32.totalorder %s657_s13, %s653_s12 }
   0xc   : > { %p738_p2 = scmp.eq.s32.totalorder %s392_s18, 0  ;;  %p127_p3 = scmp.ne.s32.totalorder %s661_s14, %s657_s13 }
   0xd   : > { %s895_s20 = smov (%p32_p0, %s30_s20), 0  ;;  %p128_p5 = scmp.eq.s32.totalorder %s392_s18, 2 }
   0xe   : > { %p748_p4 = por %p738_p2, %p76_p1  ;;  %s60_s24 = ssub.s32 %s669_s16, %s895_s20 }
   0xf   : > { %p134_p6 = scmp.eq.s32.totalorder %s393_s19, 2  ;;  %p61_p7 = scmp.eq.s32.totalorder %s60_s24, 0 }
  0x10   : > { %p754_p8 = por %p128_p5, %p127_p3  ;;  %p394_p10 = scmp.ge.s32.totalorder %s673_s17, 1 }
  0x11   : > { %p758_p9 = por %p134_p6, %p76_p1  ;;  %p141_p11 = scmp.lt.s32.totalorder %s673_s17, 4 }
  0x12   : > { %s764_s27 = scalar_select %p61_p7, %s661_s14, %s63_s21  }
  0x13   : > { %p767_p12 = pnand %p394_p10, %p141_p11  ;;  %s408_s29 = sshll.u32 %s665_s15, 5 }
  0x14   : > { %s885_s1 = sld [smem:[#allocation13_spill]]  ;;  %s675_s7 = smov [#allocation5]  }
  0x15   : > { %p877_p13 = pneg %p767_p12  ;;  %s174_s8 = sshll.u32 %s675_s7, 4  ;;  %s175_s8 = int_to_ptr.vmem [resolvable:$true] %s174_s8 }
  0x16   : > { %s887_s0 = sld [smem:[#allocation12_spill]] }
  0x17   : > { %p782_p0 = pnand %p877_p13, %p748_p4 }
  0x19   : > { %p501_p3 = pneg %p782_p0 }
  0x1a   : > { %s171_s5 = scalar_lea.hbm %s885_s1, %s408_s29  ;;  %s504_s30 = scalar_lea.hbm %s885_s1, 96 }
  0x1b   : > { %s172_s6 = sshll.u32 %s171_s5, 4  ;;  %s173_s6 = int_to_ptr.hbm [resolvable:$true] %s172_s6 }
  0x1c   : > { %s155_s18 = sshll.u32 %s887_s0, 4  ;;  %s497_s19 = sshra.s32 %s173_s6, 4  ;;  %s156_s18 = int_to_ptr.hbm [resolvable:$true] %s155_s18  ;;  %s498_s19 = int_to_ptr.hbm [resolvable:$true] %s497_s19 }
  0x1d   : > { %s499_s21 = scalar_lea.hbm %s498_s19, 32  ;;  %p505_p7 = scmp.lt.s32.totalorder %s498_s19, %s885_s1 }
  0x1e   : > { %p500_p1 = scmp.ne.s32.totalorder %s498_s19, %s499_s21  ;;  %p506_p10 = scmp.lt.s32.totalorder %s504_s30, %s499_s21 }
  0x20   : > { %p502_p5 = pnand %p501_p3, %p500_p1  ;;  %p507_p11 = por %p506_p10, %p505_p7 }
  0x22   : > { %p503_p6 = pneg %p502_p5 }
  0x24   : > { %p508_p13 = pnand %p507_p11, %p503_p6 }
  0x26   : > { %511 = shalt.err (!%p508_p13)
}
  0x27   : > { %s676_s7 = smov 128   ;;  %s677_s10 = smov 8  }
  0x28   : > { %430 = dma.hbm_to_vmem [thread:$0]  (!%p782_p0), %s173_s6, 512, %s175_s8, [#allocation6], %s676_s7, %s676_s7, %s677_s10  }
  0x29   : > { %s678_s11 = smov [#allocation2]   ;;  %p888_p1 = pneg %p767_p12 }
  0x2a   : > { %s157_s24 = sshll.u32 %s678_s11, 4  ;;  %s186_s29 = scalar_lea.hbm %s875_s2, %s665_s15  ;;  %s158_s24 = int_to_ptr.vmem [resolvable:$true] %s157_s24 }
  0x2b   : > { %p425_p5 = pnand %p888_p1, %p738_p2  ;;  %s188_s30 = sshll.u32 %s186_s29, 4  ;;  %s189_s30 = int_to_ptr.hbm [resolvable:$true] %s188_s30 }
  0x2c   : > { %s679_s4 = smov [#allocation7]   ;;  %s557_s0 = sshra.s32 %s189_s30, 4  ;;  %s558_s0 = int_to_ptr.hbm [resolvable:$true] %s557_s0 }
  0x2d   : > { %427 = dma.hbm_to_vmem [thread:$0]  (!%p425_p5), %s156_s18, 256, %s158_s24, [#allocation3], %s676_s7, %s676_s7, %s677_s10  }
  0x2e   : > { %s190_s5 = sshll.u32 %s679_s4, 4  ;;  %s559_s6 = scalar_lea.hbm %s558_s0, 1  ;;  %s191_s5 = int_to_ptr.vmem [resolvable:$true] %s190_s5 }
  0x2f   : > { %p560_p13 = scmp.ne.s32.totalorder %s558_s0, %s559_s6  ;;  %s564_s1 = scalar_lea.hbm %s875_s2, 3 }
  0x30   : > { %p565_p10 = scmp.lt.s32.totalorder %s558_s0, %s875_s2  ;;  %p566_p11 = scmp.lt.s32.totalorder %s564_s1, %s559_s6 }
  0x31   : > { %p562_p6 = pnand %p560_p13, %p501_p3 }
  0x32   : > { %p567_p1 = por %p566_p11, %p565_p10 }
  0x33   : > { %p563_p7 = pneg %p562_p6 }
  0x35   : > { %p568_p5 = pnand %p567_p1, %p563_p7 }
  0x37   : > { %571 = shalt.err (!%p568_p5)
}
  0x38   : > { %433 = dma.hbm_to_vmem [thread:$0]  (!%p782_p0), %s189_s30, 16, %s191_s5, [#allocation6]  }
  0x39   : > { %203 = sbr.rel (%p767_p12) target bundleno = 206 (0xce), region = 32 }
  0x3e   : > { %640 = dma.done.wait (%p738_p2), [#allocation3], 256  }
  0x3f   : > { %642 = vsyncadd (%p738_p2), [#allocation3], 4294967040 }
  0x40   : > { %644 = dma.done.wait (%p748_p4), [#allocation6], 528  }
  0x41   : > { %646 = vsyncadd (%p748_p4), [#allocation6], 4294966768  ;;  %v240_v0 = vld [vmem:[#allocation5 + $0x18] sm:$0xff]  ;;  %v239_v1 = vld [vmem:[#allocation5 + $0x10] sm:$0xff]  ;;  %vm245_vm0 = vcmask 261120   ;;  %s230_s0 = sand.u32 1, %s657_s13  }
  0x42   : > { %264 = vmatpush.msra.mxu0 %v240_v0  ;;  %410 = vmatpush.msra.mxu1 %v240_v0  ;;  %v238_v2 = vld [vmem:[#allocation5 + $0x8] sm:$0xff]  ;;  %v237_v3 = vld [vmem:[#allocation5] sm:$0xff]  ;;  %v235_v4 = vld [vmem:[#allocation2] sm:$0xff]  ;;  %s400_s1 = sshll.u32 %s230_s0, 4  ;;  %s409_s22 = sshll.u32 %s665_s15, 4 }
  0x43   : > { %v236_v5 = vld [vmem:[#allocation2 + $0x8] sm:$0xff]  ;;  %s291_s9 = scalar_lea.hbm %s876_s3, %s409_s22  ;;  %v496_v6 = vld [vmem:[#allocation7] ss:$0 sm:$0xff]  ;;  %s232_s18 = scalar_lea.vmem [#allocation8], %s400_s1 }
  0x44   : > { %265 = vmatpush.msra.mxu0 %v239_v1  ;;  %411 = vmatpush.msra.mxu1 %v239_v1  ;;  %s292_s7 = sshll.u32 %s232_s18, 4  ;;  %s294_s10 = sshll.u32 %s291_s9, 4  ;;  %s293_s7 = int_to_ptr.vmem [resolvable:$true] %s292_s7  ;;  %s295_s10 = int_to_ptr.hbm [resolvable:$true] %s294_s10 }
  0x45   : > { %s278_s15 = scalar_lea.sflag [#allocation4], %s230_s0  ;;  %s601_s24 = sshra.s32 %s295_s10, 4  ;;  %s602_s24 = int_to_ptr.hbm [resolvable:$true] %s601_s24 }
  0x46   : > { %266 = vmatpush.msra.mxu0 %v238_v2  ;;  %412 = vmatpush.msra.mxu1 %v238_v2  ;;  %s603_s29 = scalar_lea.hbm %s602_s24, 16  ;;  %s607_s5 = scalar_lea.hbm %s876_s3, 48 }
  0x47   : > { %p604_p2 = scmp.ne.s32.totalorder %s602_s24, %s603_s29  ;;  %p608_p0 = scmp.lt.s32.totalorder %s602_s24, %s876_s3 }
  0x48   : > { %267 = vmatpush.msra.mxu0 %v237_v3  ;;  %413 = vmatpush.msra.mxu1 %v237_v3  ;;  %p609_p3 = scmp.lt.s32.totalorder %s607_s5, %s603_s29 }
  0x49   : > { %401 = vmatmul.msk.f32.vlgmr.msra.gmra.mxu0 %vm245_vm0, %v235_v4  ;;  %402 = vmatmul.msk.f32.vlgmr.msra.gmra.mxu1 %vm245_vm0, %v236_v5  ;;  %p605_p4 = pnand %p604_p2, %p754_p8 }
  0x4a   : > { %p610_p13 = por %p609_p3, %p608_p0 }
  0x4b   : > { %p606_p12 = pneg %p605_p4 }
  0x4d   : > { %p611_p6 = pnand %p610_p13, %p606_p12 }
  0xc6   : > { %v269_v7 = vpop.f32.mrf.mxu0  ;;  %v272_v8 = vpop.f32.mrf.mxu1 }
  0xc7   : > { %v270_v9 = vadd.f32 %v496_v6, %v269_v7  ;;  %v273_v10 = vadd.f32 %v496_v6, %v272_v8 }
  0xc9   : > { %275 = vst.msk [vmem:[%s232_s18] sm:$0xff] %vm245_vm0, %v270_v9 }
  0xca   : > { %276 = vst.msk [vmem:[%s232_s18 + $0x8] sm:$0xff] %vm245_vm0, %v273_v10 }
  0xcb   : > { %614 = shalt.err (!%p611_p6)
}
  0xcc   : > { %s680_s11 = smov 128   ;;  %s681_s19 = smov 8  }
  0xcd   : > { %422 = dma.vmem_to_hbm [thread:$0]  (%p754_p8), %s293_s7, 256, %s295_s10, %s278_s15, %s680_s11, %s680_s11, %s681_s19  }
  0xce PF: > { %p440_p7 = scmp.ge.s32.totalorder %s673_s17, 2  ;;  %s309_s21 = sand.u32 1, %s653_s12  }
  0xcf   : > { %s310_s0 = scalar_lea.sflag [#allocation4], %s309_s21 }
  0xd0   : > { %p435_p10 = pnand %p440_p7, %p758_p9 }
  0xd2   : > { %p436_p11 = pneg %p435_p10 }
  0xd4   : > { %648 = dma.done.wait (%p436_p11), %s310_s0, 256  }
  0xd5   : > { %650 = vsyncadd (%p436_p11), %s310_s0, 4294967040  ;;  %s18_s17 = sadd.s32 1, %s673_s17   ;;  %s889_s12 = smov %s657_s13 }
  0xd6   : > { %p15_p1 = scmp.ge.s32.totalorder %s18_s17, 5   ;;  %s890_s13 = smov %s661_s14 }
  0xd7   : > { %s891_s14 = smov %s764_s27  ;;  %s892_s15 = smov %s669_s16 }
  0xd8   : > { %s893_s16 = smov %s895_s20  ;;  %17 = sbr.rel (!%p15_p1) target bundleno = 9 (0x9), region = 80 }
  0xdd   :  { %316 = vsyncpa [#allocation3], 1 }
  0xde   :  { %318 = vsyncpa [#allocation3 + $0x1], 1 }
  0xdf   :  { %319 = vsyncpa [#allocation6], 1 }
  0xe0   :  { %320 = vsyncpa [#allocation4], 1 }
  0xe1   :  { %322 = vsyncpa [#allocation4 + $0x1], 1 }

</bundles_post_ra>
